<compile_context>
chip_gen: v7x
topology: tpu7x:2x2x1
jax: 0.10.0
libtpu: 0.0.40
codegen_flags: <defaults>
</compile_context>

<pallas_src>
import jax
import jax.numpy as jnp
from jax.experimental import pallas as pl
from jax.experimental.pallas import tpu as pltpu

KH, KW = 3, 3  # ConvLayer default kernel_size=3


def conv_relu_kernel(x_ref, w_ref, b_ref, o_ref):
    """One grid step = one row-strip of im2row patches.

    x_ref: (Mc, K_pad)   im2row patch rows (K padded to a multiple of 128)
    w_ref: (K_pad, P)    im2row-lowered conv weights, resident in VMEM
    b_ref: (1, P)        bias tiled across W, f32
    o_ref: (Mc, P)       lane-dense output rows
    """
    acc = jnp.dot(x_ref[...], w_ref[...], preferred_element_type=jnp.float32)
    acc = acc + b_ref[...]              # bias (norm_type=None -> bias=True), f32
    o_ref[...] = jnp.maximum(acc, 0.0).astype(o_ref.dtype)   # ReLU epilogue, f32


def _build_im2row_weight(w_hwio, W):
    """(KH, KW, C_in, C_out) -> (KH*(W+KW-1)*C_in, W*C_out) banded matrix.

    W_mat[kh*(W+KW-1)*C_in + (w+kw)*C_in + ci, w*C_out + co] = w_hwio[kh,kw,ci,co]
    so that out[h, w*C_out+co] = x_cat[h, :] @ W_mat, where x_cat row h is the
    concatenation over kh of padded input row (h+kh), flattened over (W+2, C_in).
    Built with one vectorized scatter (trace-time only).
    """
    kh_n, kw_n, c_in, c_out = w_hwio.shape
    wp = W + kw_n - 1
    k3 = kh_n * wp * c_in
    p_dim = W * c_out

    kh = jnp.arange(kh_n)[:, None, None, None, None]
    kw = jnp.arange(kw_n)[None, :, None, None, None]
    ci = jnp.arange(c_in)[None, None, :, None, None]
    co = jnp.arange(c_out)[None, None, None, :, None]
    wi = jnp.arange(W)[None, None, None, None, :]

    shape = (kh_n, kw_n, c_in, c_out, W)
    rows = jnp.broadcast_to(kh * (wp * c_in) + (wi + kw) * c_in + ci, shape)
    cols = jnp.broadcast_to(wi * c_out + co, shape)
    vals = jnp.broadcast_to(w_hwio[..., None], shape)

    w_mat = jnp.zeros((k3, p_dim), dtype=w_hwio.dtype)
    return w_mat.at[rows.ravel(), cols.ravel()].set(vals.ravel())


def conv_layer_forward(x_nchw, weight, bias, *, compute_dtype=jnp.bfloat16):
    """Equivalent of ConvLayer(c_in, c_out).forward(x) with defaults:
    Conv2d(c_in, c_out, k=3, s=1, p=1, bias=True) -> ReLU.

    x_nchw: (N, C_in, H, W)
    weight: (C_out, C_in, 3, 3)   (PyTorch layout)
    bias:   (C_out,)
    compute_dtype: dtype of the MXU operands (default bf16; accumulation and
                   bias/ReLU epilogue stay f32; pass jnp.float32 for exactness).
    returns (N, C_out, H, W)
    """
    N, C_in, H, W = x_nchw.shape
    C_out = weight.shape[0]
    mm_dtype = compute_dtype if compute_dtype is not None else x_nchw.dtype

    Wp = W + KW - 1                       # padded width
    K3 = KH * Wp * C_in                   # fused contraction axis (im2row)
    K_pad = ((K3 + 127) // 128) * 128     # lane-dense contraction axis
    P_dim = W * C_out                     # lane axis of the output (128 here)
    M = N * H                             # fused M axis (batch * rows)

    # ---- wrapper-side glue (plain JAX): layout, padding, im2row, weight lowering
    x_nhwc = jnp.transpose(x_nchw, (0, 2, 3, 1))                  # (N,H,W,C_in)
    x_pad = jnp.pad(x_nhwc, ((0, 0), (1, 1), (1, 1), (0, 0)))     # padding=1
    x_rows = x_pad.reshape(N, H + KH - 1, Wp * C_in)              # (N,H+2,(W+2)*Cin)
    x_cat = jnp.concatenate([x_rows[:, kh:kh + H, :] for kh in range(KH)],
                            axis=-1)                              # (N,H,K3)
    x_cat = x_cat.reshape(M, K3)
    x_cat = jnp.pad(x_cat, ((0, 0), (0, K_pad - K3))).astype(mm_dtype)

    w_hwio = jnp.transpose(weight, (2, 3, 1, 0))                  # (KH,KW,Cin,Cout)
    w_mat = _build_im2row_weight(w_hwio, W)                       # (K3, P)
    w_mat = jnp.pad(w_mat, ((0, K_pad - K3), (0, 0))).astype(mm_dtype)
    b_tiled = jnp.tile(bias, W).reshape(1, P_dim).astype(jnp.float32)

    # Two independent row-strip chunks: keeps both v7x TensorCores busy while
    # adding only one extra (~0.35 us) step on single-TC v5e/v6e.
    num_chunks = 2 if (M % 2 == 0 and (M // 2) % 8 == 0) else 1
    Mc = M // num_chunks

    out_flat = pl.pallas_call(
        conv_relu_kernel,
        out_shape=jax.ShapeDtypeStruct((M, P_dim), x_nchw.dtype),
        grid_spec=pltpu.PrefetchScalarGridSpec(
            num_scalar_prefetch=0,
            grid=(num_chunks,),
            in_specs=[
                pl.BlockSpec((Mc, K_pad), lambda c: (c, 0)),
                # constant index_map -> lowered weights stay resident in VMEM
                # (pipeline_mode=pl.Buffered(1) would halve their VMEM once W grows)
                pl.BlockSpec((K_pad, P_dim), lambda c: (0, 0)),
                pl.BlockSpec((1, P_dim), lambda c: (0, 0)),
            ],
            out_specs=pl.BlockSpec((Mc, P_dim), lambda c: (c, 0)),
        ),
        compiler_params=pltpu.CompilerParams(
            dimension_semantics=("parallel",),
            vmem_limit_bytes=32 * 1024 * 1024,   # safe on v5e/v6e/v7x
        ),
    )(x_cat, w_mat, b_tiled)

    # TODO(synk): for large H/W/C, the O(W^2) mostly-zero im2row weight blows
    # VMEM (earliest on v7x's 64 MiB); switch to H-row-strip tiling with a
    # 2-row halo and 128-padded channels instead.
    out_nhwc = out_flat.reshape(N, H, W, C_out)
    return jnp.transpose(out_nhwc, (0, 3, 1, 2))                  # back to NCHW


if __name__ == "__main__":
    key = jax.random.PRNGKey(0)
    k_x, k_w, k_b = jax.random.split(key, 3)

    N, C_in, H, W = 2, 4, 16, 16
    C_out = 8

    x = jax.random.normal(k_x, (N, C_in, H, W), dtype=jnp.float32)
    # Deterministic synthetic parameters (PyTorch Conv2d shapes/init bounds).
    fan_in = C_in * KH * KW
    bound = 1.0 / (fan_in ** 0.5)
    weight = jax.random.uniform(k_w, (C_out, C_in, KH, KW),
                                minval=-bound, maxval=bound, dtype=jnp.float32)
    bias = jax.random.uniform(k_b, (C_out,),
                              minval=-bound, maxval=bound, dtype=jnp.float32)

    # Reference: XLA conv + bias + ReLU.
    ref = jax.lax.conv_general_dilated(
        x, weight, window_strides=(1, 1), padding=((1, 1), (1, 1)),
        dimension_numbers=("NCHW", "OIHW", "NCHW"))
    ref = jnp.maximum(ref + bias[None, :, None, None], 0.0)

    # Exact f32-operand path: tight check of the im2row index math.
    out_f32 = jax.block_until_ready(
        conv_layer_forward(x, weight, bias, compute_dtype=jnp.float32))
    assert out_f32.shape == (N, C_out, H, W)
    assert jnp.allclose(out_f32, ref, atol=1e-5, rtol=1e-5), "f32 mismatch vs reference"

    # Default bf16-operand path (f32 accumulate/epilogue): loose tolerance.
    out_bf16 = jax.block_until_ready(conv_layer_forward(x, weight, bias))
    assert out_bf16.shape == (N, C_out, H, W)
    assert jnp.allclose(out_bf16, ref, atol=1e-1, rtol=1e-1), "bf16 mismatch vs reference"

    print("KERNEL_OK")
</pallas_src>

<mosaic_0001>
module attributes {stable_mosaic.version = 11 : i64} {
  func.func @conv_relu_kernel(%arg0: i32, %arg1: memref<16x256xf32, #tpu.memory_space<vmem>>, %arg2: memref<256x128xf32, #tpu.memory_space<vmem>>, %arg3: memref<1x128xf32, #tpu.memory_space<vmem>>, %arg4: memref<16x128xf32, #tpu.memory_space<vmem>>) attributes {dimension_semantics = [#tpu.dimension_semantics<parallel>], iteration_bounds = array<i64: 2>, scalar_prefetch = 0 : i64, scratch_operands = 0 : i64, tpu.core_type = #tpu.core_type<tc>, window_params = [{transform_indices = @transform_0, window_bounds = array<i64: 16, 256>}, {pipeline_mode = #tpu.pipeline_mode<synchronous>, transform_indices = @transform_1, window_bounds = array<i64: 256, 128>}, {pipeline_mode = #tpu.pipeline_mode<synchronous>, transform_indices = @transform_2, window_bounds = array<i64: 1, 128>}, {transform_indices = @transform_3, window_bounds = array<i64: 16, 128>}]} {
    %c0 = arith.constant 0 : index
    %c0_0 = arith.constant 0 : index
    %0 = vector.load %arg1[%c0, %c0_0] : memref<16x256xf32, #tpu.memory_space<vmem>>, vector<16x256xf32>
    %c0_1 = arith.constant 0 : index
    %c0_2 = arith.constant 0 : index
    %1 = vector.load %arg2[%c0_1, %c0_2] : memref<256x128xf32, #tpu.memory_space<vmem>>, vector<256x128xf32>
    %cst = arith.constant dense<0.000000e+00> : vector<16x128xf32>
    %2 = tpu.matmul %0, %1, %cst {dimension_numbers = #tpu.dot_dimension_numbers<[1], [0], [0], [1], [0, 0, 1, 1], [], []>} : vector<16x256xf32>, vector<256x128xf32>, vector<16x128xf32> -> vector<16x128xf32>
    %c0_3 = arith.constant 0 : index
    %c0_4 = arith.constant 0 : index
    %3 = vector.load %arg3[%c0_3, %c0_4] : memref<1x128xf32, #tpu.memory_space<vmem>>, vector<1x128xf32>
    %4 = vector.broadcast %3 : vector<1x128xf32> to vector<16x128xf32>
    %5 = arith.addf %2, %4 : vector<16x128xf32>
    %cst_5 = arith.constant 0.000000e+00 : f32
    %6 = vector.broadcast %cst_5 : f32 to vector<16x128xf32>
    %7 = arith.maximumf %5, %6 : vector<16x128xf32>
    %c0_6 = arith.constant 0 : index
    %c0_7 = arith.constant 0 : index
    %8 = vector.load %arg4[%c0_6, %c0_7] : memref<16x128xf32, #tpu.memory_space<vmem>>, vector<16x128xf32>
    tpu.vector_store %arg4[%c0_6, %c0_7], %7 {strides = array<i32>} : memref<16x128xf32, #tpu.memory_space<vmem>>, vector<16x128xf32>,
    return
  }
  func.func @transform_0(%arg0: i32) -> (i32, i32) {
    %c0_i32 = arith.constant 0 : i32
    %c0_i32_0 = arith.constant 0 : i32
    return %arg0, %c0_i32 : i32, i32
  }
  func.func @transform_1(%arg0: i32) -> (i32, i32) {
    %c0_i32 = arith.constant 0 : i32
    %c0_i32_0 = arith.constant 0 : i32
    %c0_i32_1 = arith.constant 0 : i32
    return %c0_i32, %c0_i32_0 : i32, i32
  }
  func.func @transform_2(%arg0: i32) -> (i32, i32) {
    %c0_i32 = arith.constant 0 : i32
    %c0_i32_0 = arith.constant 0 : i32
    %c0_i32_1 = arith.constant 0 : i32
    return %c0_i32, %c0_i32_0 : i32, i32
  }
  func.func @transform_3(%arg0: i32) -> (i32, i32) {
    %c0_i32 = arith.constant 0 : i32
    %c0_i32_0 = arith.constant 0 : i32
    return %arg0, %c0_i32 : i32, i32
  }
}

</mosaic_0001>

<bundles_post_ra>
// kernel: tpu_custom_call.1
= control target key start
LH: loop header
LB: loop body
LE: loop exit
PB: predicated region body
PF: predicated region fallthrough
CT: control target
= control target key end

     0   :  { %8 = vsyncpa [#allocation3], 0  ;;  %s966_s0 = inlined_call_operand.hbm [shape: f32[32,256], index: 0, kind: input, shape index: {}]   ;;  %s967_s1 = inlined_call_operand.hbm [shape: f32[256,128], index: 1, kind: input, shape index: {}]   ;;  %s968_s2 = inlined_call_operand.vmem [shape: f32[1,128], index: 2, kind: input, shape index: {}]   ;;  %s969_s3 = inlined_call_operand.hbm [shape: f32[32,128], index: 3, kind: output, shape index: {}]  }
   0x1   :  { %10 = vsyncpa [#allocation3 + $0x1], 0 }
   0x2   :  { %11 = vsyncpa [#allocation6], 0 }
   0x3   :  { %12 = vsyncpa [#allocation4], 0 }
   0x4   :  { %14 = vsyncpa [#allocation4 + $0x1], 0  ;;  %s755_s12 = smov 0   ;;  %s757_s13 = smov 0  }
   0x5   :  { %s759_s14 = smov 0   ;;  %s761_s15 = smov 0  }
   0x6 LB: > { %s776_s16 = sadd.s32 4294967295, %s724_s15   ;;  %s426_s17 = sadd.s32 4294967294, %s724_s15   ;;  %s724_s15 = sphi %s761_s15, %s989_s15   ;;  %s720_s14 = sphi %s759_s14, %s988_s14   ;;  %s716_s13 = sphi %s757_s13, %s987_s13   ;;  %s712_s12 = sphi %s755_s12, %s986_s12  }
   0x7   : > { %p40_p0 = scmp.ne.s32.totalorder %s716_s13, %s712_s12  ;;  %p970_p1 = scmp.eq.s32.totalorder %s776_s16, 0 }
   0x8   : > { %p112_p3 = scmp.eq.s32.totalorder %s426_s17, 1  ;;  %p427_p5 = scmp.ge.s32.totalorder %s724_s15, 1 }
   0x9   : > { %p785_p4 = por %p970_p1, %p40_p0  ;;  %p119_p7 = scmp.lt.s32.totalorder %s724_s15, 3 }
   0xa   : > { %p790_p6 = por %p112_p3, %p40_p0  ;;  %s726_s21 = smov [#allocation5]  }
   0xb   : > { %s973_s18 = scalar_select %p785_p4, 1, 0 }
   0xc   : > { %s974_s19 = scalar_select %p790_p6, 1, 0 }
   0xd   : > { %p795_p8 = pnand %p427_p5, %p119_p7  ;;  %s131_s22 = sshll.u32 %s726_s21, 4  ;;  %s799_s22 = int_to_ptr.vmem [resolvable:$true] %s131_s22 }
   0xe   : > { %s811_s24 = sadd.s32 1, %s724_s15   ;;  %s27_s25 = sadd.s32 1, %s720_s14 }
   0xf   : > { %s975_s20 = scalar_select %p795_p8, 1, 0 }
  0x10   : > { %p541_p9 = pneg %p795_p8  ;;  %s24_s26 = ssub.s32 %s724_s15, %s811_s24 }
  0x11   : > { %s596_s29 = scalar_lea.hbm %s967_s1, 4096 }
  0x12   : > { %p806_p11 = pnand %p541_p9, %p970_p1  ;;  %p597_p12 = scmp.ne.s32.totalorder %s967_s1, %s596_s29 }
  0x13   : > { %p603_p5 = scmp.lt.u32.totalorder %s596_s29, %s967_s1 }
  0x14   : > { %p598_p13 = pneg %p806_p11 }
  0x16   : > { %p599_p0 = pnand %p598_p13, %p597_p12 }
  0x18   : > { %p600_p3 = pneg %p599_p0 }
  0x1a   : > { %p605_p7 = pnand %p603_p5, %p600_p3 }
  0x1c   : > { %608 = shalt.err (!%p605_p7)
}
  0x1d   : > { %s609_s7 = scalar_lea.vmem %s799_s22, 4096  ;;  %p617_p2 = scmp.lt.s32.totalorder %s799_s22, %s799_s22 }
  0x1e   : > { %p610_p9 = scmp.ne.s32.totalorder %s799_s22, %s609_s7  ;;  %p618_p6 = scmp.lt.s32.totalorder %s609_s7, %s609_s7 }
  0x20   : > { %p612_p10 = pnand %p610_p9, %p598_p13  ;;  %p619_p4 = por %p618_p6, %p617_p2 }
  0x22   : > { %p613_p1 = pneg %p612_p10 }
  0x24   : > { %p620_p8 = pnand %p619_p4, %p613_p1 }
  0x26   : > { %623 = shalt.err (!%p620_p8)
}
  0x27   : > { %s727_s8 = smov 128   ;;  %s728_s9 = smov 8  }
  0x28   : > { %544 = dma.hbm_to_vmem [thread:$0]  (!%p806_p11), %s967_s1, 4096, %s799_s22, [#allocation6], %s727_s8, %s727_s8, %s728_s9  }
  0x29   : > { %p25_p2 = scmp.eq.s32.totalorder %s24_s26, 0  ;;  %p34_p1 = scmp.ne.s32.totalorder %s720_s14, %s716_s13 }
  0x2a   : > { %p35_p4 = scmp.eq.s32.totalorder %s724_s15, 0  ;;  %p554_p6 = scmp.lt.s32.totalorder %s724_s15, 2 }
  0x2b   : > { %s842_s17 = scalar_select %p25_p2, %s720_s14, %s27_s25  }
  0x2c   : > { %p36_p8 = por %p35_p4, %p34_p1  ;;  %p977_p10 = scmp.eq.s32.totalorder %s776_s16, 1 }
  0x2d   : > { %s148_s27 = sand.u32 1, %s720_s14   ;;  %s445_s28 = sshll.u32 %s724_s15, 9 }
  0x2e   : > { %p846_p12 = por %p977_p10, %p34_p1  ;;  %s430_s29 = sshll.u32 %s148_s27, 5 }
  0x2f   : > { %s855_s4 = scalar_lea.hbm %s966_s0, %s445_s28  ;;  %s152_s22 = scalar_lea.vmem [#allocation2], %s430_s29 }
  0x30   : > { %s160_s25 = sshll.u32 %s152_s22, 4  ;;  %p857_p11 = pnand %p554_p6, %p36_p8  ;;  %s861_s25 = int_to_ptr.vmem [resolvable:$true] %s160_s25 }
  0x31   : > { %s863_s5 = scalar_lea.sflag [#allocation3], %s148_s27  ;;  %s624_s6 = scalar_lea.hbm %s855_s4, 512 }
  0x32   : > { %p625_p13 = scmp.ne.s32.totalorder %s855_s4, %s624_s6  ;;  %p626_p0 = pneg %p857_p11 }
  0x33   : > { %s629_s9 = scalar_lea.hbm %s966_s0, 1024  ;;  %p630_p7 = scmp.lt.u32.totalorder %s855_s4, %s966_s0 }
  0x34   : > { %p627_p3 = pnand %p626_p0, %p625_p13  ;;  %p631_p9 = scmp.lt.u32.totalorder %s629_s9, %s624_s6 }
  0x35   : > { %p633_p1 = scmp.lt.u32.totalorder %s624_s6, %s855_s4 }
  0x36   : > { %p628_p5 = pneg %p627_p3  ;;  %p632_p2 = por %p631_p9, %p630_p7 }
  0x38   : > { %p634_p4 = por %p633_p1, %p632_p2 }
  0x3a   : > { %p635_p6 = pnand %p634_p4, %p628_p5 }
  0x3c   : > { %638 = shalt.err (!%p635_p6)
}
  0x3d   : > { %s639_s27 = scalar_lea.vmem %s861_s25, 512  ;;  %s729_s28 = smov [#allocation2]  }
  0x3e   : > { %p640_p8 = scmp.ne.s32.totalorder %s861_s25, %s639_s27  ;;  %s644_s29 = sshll.u32 %s729_s28, 4  ;;  %s645_s29 = int_to_ptr.vmem [resolvable:$false] %s644_s29 }
  0x3f   : > { %s646_s23 = scalar_lea.vmem %s645_s29, 1024  ;;  %p647_p3 = scmp.lt.s32.totalorder %s861_s25, %s645_s29 }
  0x40   : > { %p642_p10 = pnand %p640_p8, %p626_p0  ;;  %p648_p7 = scmp.lt.s32.totalorder %s646_s23, %s639_s27 }
  0x42   : > { %p643_p13 = pneg %p642_p10  ;;  %p649_p9 = por %p648_p7, %p647_p3 }
  0x44   : > { %p650_p2 = pnand %p649_p9, %p643_p13 }
  0x46   : > { %653 = shalt.err (!%p650_p2)
}
  0x47   : > { %s730_s30 = smov 256   ;;  %s731_s22 = smov 16  }
  0x48   : > { %548 = dma.hbm_to_vmem [thread:$0]  (!%p857_p11), %s855_s4, 512, %s861_s25, %s863_s5, %s730_s30, %s730_s30, %s731_s22  }
  0x49   : > { %p980_p0 = scmp.ne.s32.totalorder %s975_s20, 0 }
  0x4a   : > { %s894_s6 = sand.u32 (!%p980_p0), 1, %s716_s13   ;;  %p981_p5 = scmp.ne.s32.totalorder (!%p980_p0), %s973_s18, 0 }
  0x4b   : > { %172 = sbr.rel (%p980_p0) target bundleno = 355 (0x163), region = 32  ;;  %s435_s7 = sshll.u32 (!%p980_p0), %s894_s6, 5 }
  0x4c   : > { %s175_s8 = scalar_lea.sflag (!%p980_p0), [#allocation3], %s894_s6  ;;  %s898_s9 = scalar_lea.vmem (!%p980_p0), [#allocation2], %s435_s7 }
  0x52   : > { %699 = dma.done.wait (%p981_p5), %s175_s8, 512  }
  0x53   : > { %701 = vsyncadd (%p981_p5), %s175_s8, 4294966784  ;;  %p982_p11 = scmp.eq.s32.totalorder %s776_s16, 0 }
  0x55   : > { %703 = dma.done.wait (%p982_p11), [#allocation6], 4096   ;;  %p983_p1 = pmov %p982_p11 }
  0x56   : > { %v227_v0 = vld [vmem:[#allocation5 + $0x80] sm:$0xff]  ;;  %v228_v1 = vld [vmem:[#allocation5 + $0x88] sm:$0xff]  ;;  %v229_v5 = vld [vmem:[#allocation5 + $0x90] sm:$0xff]  ;;  %s437_s18 = sshll.u32 %s894_s6, 4  ;;  %s446_s5 = sshll.u32 %s776_s16, 8 }
  0x57   : > { %705 = vsyncadd (%p983_p1), [#allocation6], 4294963200  ;;  %v211_v2 = vld [vmem:[#allocation5] sm:$0xff]  ;;  %v485_v3 = vpack.c.bf16 %v228_v1, %v227_v0  ;;  %v212_v4 = vld [vmem:[#allocation5 + $0x8] sm:$0xff]  ;;  %s204_s25 = scalar_lea.vmem [#allocation7], %s437_s18  ;;  %s922_s27 = scalar_lea.hbm %s969_s3, %s446_s5 }
  0x58   : > { %v230_v6 = vld [vmem:[#allocation5 + $0x98] sm:$0xff]  ;;  %v487_v7 = vpack.c.bf16 %v212_v4, %v211_v2  ;;  %v213_v9 = vld [vmem:[#allocation5 + $0x10] sm:$0xff]  ;;  %v231_v11 = vld [vmem:[#allocation5 + $0xa0] sm:$0xff]  ;;  %s343_s26 = sshll.u32 %s204_s25, 4  ;;  %s330_s28 = scalar_lea.sflag [#allocation4], %s894_s6  ;;  %s917_s26 = int_to_ptr.vmem [resolvable:$true] %s343_s26 }
  0x59   : > { %v489_v8 = vpack.c.bf16 %v230_v6, %v229_v5  ;;  %v214_v10 = vld [vmem:[#allocation5 + $0x18] sm:$0xff]  ;;  %486 = vmatprep.subr.bf16.mxu0 %v485_v3  ;;  %517 = vmatprep.subr.bf16.mxu1 %v485_v3  ;;  %v232_v12 = vld [vmem:[#allocation5 + $0xa8] sm:$0xff]  ;;  %v215_v15 = vld [vmem:[#allocation5 + $0x20] sm:$0xff]  ;;  %s654_s29 = scalar_lea.vmem %s917_s26, 256  ;;  %s732_s16 = smov [#allocation7]  }
  0x5a   : > { %488 = vmatpush3.bf16.msra.mxu0 %v487_v7  ;;  %525 = vmatpush3.bf16.msra.mxu1 %v487_v7  ;;  %v491_v13 = vpack.c.bf16 %v214_v10, %v213_v9  ;;  %v493_v14 = vpack.c.bf16 %v232_v12, %v231_v11  ;;  %v216_v16 = vld [vmem:[#allocation5 + $0x28] sm:$0xff]  ;;  %v233_v17 = vld [vmem:[#allocation5 + $0xb0] sm:$0xff]  ;;  %v234_v18 = vld [vmem:[#allocation5 + $0xb8] sm:$0xff]  ;;  %p655_p4 = scmp.ne.s32.totalorder %s917_s26, %s654_s29  ;;  %s658_s23 = sshll.u32 %s732_s16, 4  ;;  %s659_s23 = int_to_ptr.vmem [resolvable:$false] %s658_s23 }
  0x5b   : > { %490 = vmatprep.subr.bf16.mxu0 %v489_v8  ;;  %518 = vmatprep.subr.bf16.mxu1 %v489_v8  ;;  %v495_v19 = vpack.c.bf16 %v216_v16, %v215_v15  ;;  %v497_v20 = vpack.c.bf16 %v234_v18, %v233_v17  ;;  %v217_v21 = vld [vmem:[#allocation5 + $0x30] sm:$0xff]  ;;  %v218_v22 = vld [vmem:[#allocation5 + $0x38] sm:$0xff]  ;;  %v235_v23 = vld [vmem:[#allocation5 + $0xc0] sm:$0xff]  ;;  %s660_s30 = scalar_lea.vmem %s659_s23, 512  ;;  %p661_p10 = scmp.lt.s32.totalorder %s917_s26, %s659_s23 }
  0x5c   : > { %v236_v24 = vld [vmem:[#allocation5 + $0xc8] sm:$0xff]  ;;  %v210_v26 = vld [vmem:[%s898_s9 + $0x18] sm:$0xff]  ;;  %v499_v27 = vpack.c.bf16 %v218_v22, %v217_v21  ;;  %v219_v29 = vld [vmem:[#allocation5 + $0x40] sm:$0xff]  ;;  %p656_p6 = pnand %p655_p4, %p846_p12  ;;  %p662_p13 = scmp.lt.s32.totalorder %s660_s30, %s654_s29 }
  0x5d   : > { %v208_v25 = vld [vmem:[%s898_s9 + $0x8] sm:$0xff]  ;;  %v501_v28 = vpack.c.bf16 %v236_v24, %v235_v23  ;;  %v237_v31 = vld [vmem:[#allocation5 + $0xd0] sm:$0xff]  ;;  %v238_v32 = vld [vmem:[#allocation5 + $0xd8] sm:$0xff]  ;;  %319 = vmatprep.mubr.f32.mxu1 %v210_v26 }
  0x5e   : > { %492 = vmatpush3.bf16.msra.mxu0 %v491_v13  ;;  %526 = vmatpush3.bf16.msra.mxu1 %v491_v13  ;;  %v220_v30 = vld [vmem:[#allocation5 + $0x48] sm:$0xff]  ;;  %v505_v34 = vpack.c.bf16 %v238_v32, %v237_v31  ;;  %v221_v35 = vld [vmem:[#allocation5 + $0x50] sm:$0xff]  ;;  %v222_v36 = vld [vmem:[#allocation5 + $0x58] sm:$0xff]  ;;  %p657_p8 = pneg %p656_p6  ;;  %p663_p3 = por %p662_p13, %p661_p10 }
  0x5f   : > { %494 = vmatprep.subr.bf16.mxu0 %v493_v14  ;;  %519 = vmatprep.subr.bf16.mxu1 %v493_v14  ;;  %v503_v33 = vpack.c.bf16 %v220_v30, %v219_v29  ;;  %v239_v37 = vld [vmem:[#allocation5 + $0xe0] sm:$0xff]  ;;  %v240_v38 = vld [vmem:[#allocation5 + $0xe8] sm:$0xff]  ;;  %v507_v39 = vpack.c.bf16 %v222_v36, %v221_v35  ;;  %v241_v43 = vld [vmem:[#allocation5 + $0xf0] sm:$0xff] }
  0x60   : > { %314 = vmatprep.mubr.f32.mxu0 %v208_v25  ;;  %v509_v40 = vpack.c.bf16 %v240_v38, %v239_v37  ;;  %v223_v41 = vld [vmem:[#allocation5 + $0x60] sm:$0xff]  ;;  %v224_v42 = vld [vmem:[#allocation5 + $0x68] sm:$0xff]  ;;  %v242_v44 = vld [vmem:[#allocation5 + $0xf8] sm:$0xff]  ;;  %p664_p7 = pnand %p663_p3, %p657_p8 }
  0x61   : > { %v511_v45 = vpack.c.bf16 %v224_v42, %v223_v41  ;;  %v513_v46 = vpack.c.bf16 %v242_v44, %v241_v43  ;;  %v225_v47 = vld [vmem:[#allocation5 + $0x70] sm:$0xff]  ;;  %v226_v48 = vld [vmem:[#allocation5 + $0x78] sm:$0xff]  ;;  %v207_v50 = vld [vmem:[%s898_s9] sm:$0xff] }
  0x62   : > { %496 = vmatpush3.bf16.msra.mxu0 %v495_v19  ;;  %527 = vmatpush3.bf16.msra.mxu1 %v495_v19  ;;  %v515_v49 = vpack.c.bf16 %v226_v48, %v225_v47  ;;  %v209_v51 = vld [vmem:[%s898_s9 + $0x10] sm:$0xff]  ;;  %v438_v54 = vld [vmem:[%s968_s2] ss:$0 sm:$0xff] }
  0x63   : > { %498 = vmatprep.subr.bf16.mxu0 %v497_v20  ;;  %520 = vmatprep.subr.bf16.mxu1 %v497_v20 }
  0x66   : > { %500 = vmatpush3.bf16.msra.mxu0 %v499_v27  ;;  %528 = vmatpush3.bf16.msra.mxu1 %v499_v27 }
  0x67   : > { %502 = vmatprep.subr.bf16.mxu0 %v501_v28  ;;  %521 = vmatprep.subr.bf16.mxu1 %v501_v28 }
  0x6a   : > { %504 = vmatpush3.bf16.msra.mxu0 %v503_v33  ;;  %529 = vmatpush3.bf16.msra.mxu1 %v503_v33 }
  0x6b   : > { %506 = vmatprep.subr.bf16.mxu0 %v505_v34  ;;  %522 = vmatprep.subr.bf16.mxu1 %v505_v34 }
  0x6e   : > { %508 = vmatpush3.bf16.msra.mxu0 %v507_v39  ;;  %530 = vmatpush3.bf16.msra.mxu1 %v507_v39 }
  0x6f   : > { %510 = vmatprep.subr.bf16.mxu0 %v509_v40  ;;  %523 = vmatprep.subr.bf16.mxu1 %v509_v40 }
  0x72   : > { %512 = vmatpush3.bf16.msra.mxu0 %v511_v45  ;;  %531 = vmatpush3.bf16.msra.mxu1 %v511_v45 }
  0x73   : > { %514 = vmatprep.subr.bf16.mxu0 %v513_v46  ;;  %524 = vmatprep.subr.bf16.mxu1 %v513_v46 }
  0x76   : > { %516 = vmatpush3.bf16.msra.mxu0 %v515_v49  ;;  %532 = vmatpush3.bf16.msra.mxu1 %v515_v49 }
  0x79   : > { %315 = vmatmul.mubr.f32.vlgmr.msra.gmra.mrb[0].mxu0 %v207_v50  ;;  %320 = vmatmul.mubr.f32.vlgmr.msra.gmra.mrb[0].mxu1 %v209_v51 }
 0x14c   : > { %v479_v52 = vpop.f32.mrb[0].mxu0  ;;  %v482_v53 = vpop.f32.mrb[0].mxu1 }
 0x14d   : > { %v480_v55 = vpop.f32.mrb[1].mxu0  ;;  %v483_v56 = vpop.f32.mrb[1].mxu1 }
 0x14e   : > { %v481_v57 = vadd.f32 %v480_v55, %v479_v52  ;;  %v484_v58 = vadd.f32 %v483_v56, %v482_v53 }
 0x150   : > { %v317_v59 = vadd.f32 %v481_v57, %v438_v54  ;;  %v322_v60 = vadd.f32 %v484_v58, %v438_v54 }
 0x152   : > { %v325_v61 = vmax.f32 %v317_v59, 0.0  ;;  %v326_v62 = vmax.f32 %v322_v60, 0.0 }
 0x154   : > { %327 = vst [vmem:[%s204_s25] sm:$0xff] %v325_v61  ;;  %328 = vst [vmem:[%s204_s25 + $0x8] sm:$0xff] %v326_v62 }
 0x155   : > { %667 = shalt.err (!%p664_p7)
}
 0x156   : > { %s668_s22 = scalar_lea.hbm %s922_s27, 256  ;;  %s672_s9 = scalar_lea.hbm %s969_s3, 512 }
 0x157   : > { %p669_p9 = scmp.ne.s32.totalorder %s922_s27, %s668_s22  ;;  %p673_p5 = scmp.lt.u32.totalorder %s922_s27, %s969_s3 }
 0x158   : > { %p674_p11 = scmp.lt.u32.totalorder %s672_s9, %s668_s22  ;;  %p676_p4 = scmp.lt.u32.totalorder %s668_s22, %s922_s27 }
 0x159   : > { %p670_p2 = pnand %p669_p9, %p846_p12 }
 0x15a   : > { %p675_p1 = por %p674_p11, %p673_p5 }
 0x15b   : > { %p671_p0 = pneg %p670_p2 }
 0x15c   : > { %p677_p6 = por %p676_p4, %p675_p1 }
 0x15e   : > { %p678_p8 = pnand %p677_p6, %p671_p0 }
 0x160   : > { %681 = shalt.err (!%p678_p8)
}
 0x161   : > { %s733_s4 = smov 128   ;;  %s734_s25 = smov 8  }
 0x162   : > { %539 = dma.vmem_to_hbm [thread:$0]  (%p846_p12), %s917_s26, 256, %s922_s27, %s330_s28, %s733_s4, %s733_s4, %s734_s25  }
 0x163 PF: > { %s358_s5 = sand.u32 1, %s712_s12   ;;  %p984_p10 = scmp.ne.s32.totalorder %s974_s19, 0 }
 0x164   : > { %p985_p13 = scmp.ge.s32.totalorder %s724_s15, 2  ;;  %s359_s10 = scalar_lea.sflag [#allocation4], %s358_s5 }
 0x166   : > { %p550_p3 = pnand %p985_p13, %p984_p10 }
 0x168   : > { %707 = dma.done.wait (!%p550_p3), %s359_s10, 256  }
 0x169   : > { %709 = vsyncadd (!%p550_p3), %s359_s10, 4294967040  ;;  %p17_p7 = scmp.ge.s32.totalorder %s811_s24, 4   ;;  %s986_s12 = smov %s716_s13 }
 0x16a   : > { %s987_s13 = smov %s720_s14  ;;  %s988_s14 = smov %s842_s17 }
 0x16b   : > { %s989_s15 = smov %s811_s24  ;;  %19 = sbr.rel (!%p17_p7) target bundleno = 6 (0x6), region = 81 }
 0x172   :  { %364 = vsyncpa [#allocation3], 1 }
 0x173   :  { %366 = vsyncpa [#allocation3 + $0x1], 1 }
 0x174   :  { %367 = vsyncpa [#allocation6], 1 }
 0x175   :  { %368 = vsyncpa [#allocation4], 1 }
 0x176   :  { %370 = vsyncpa [#allocation4 + $0x1], 1 }

</bundles_post_ra>
